<compile_context>
chip_gen: v6e
topology: v6e:2x2x1
jax: 0.10.0
libtpu: 0.0.40
codegen_flags: <defaults>
</compile_context>

<pallas_src>
import numpy as np
import jax
import jax.numpy as jnp
from jax.experimental import pallas as pl
from jax.experimental.pallas import tpu as pltpu


def _poly_basis_kernel(theta_b_ref, theta_f_ref, bb_ref, fb_ref,
                       back_ref, fore_ref):
    # Two small MXU matmuls, f32 accumulation, cast only at the store.
    back_ref[...] = jnp.dot(
        theta_b_ref[...], bb_ref[...], preferred_element_type=jnp.float32
    ).astype(back_ref.dtype)
    fore_ref[...] = jnp.dot(
        theta_f_ref[...], fb_ref[...], preferred_element_type=jnp.float32
    ).astype(fore_ref.dtype)


def make_polynomial_basis(degree: int, backcast_length: int, forecast_length: int,
                          *, out_dtype=jnp.float32, batch_tile: int = 8192):
    """Builds the deterministic polynomial bases (same construction as the
    PyTorch __init__) and returns (jitted forward, forecast_basis, backcast_basis).

    forward(theta_b, theta_f) -> (forecast, backcast), matching torch semantics:
        forecast = theta_f @ forecast_basis
        backcast = theta_b @ backcast_basis
    """
    K = degree + 1
    Lb, Lf = backcast_length, forecast_length

    t_back = np.linspace(0.0, 1.0, Lb + 1)[:-1]
    t_fore = np.linspace(0.0, 1.0, Lf + 1)[:-1]
    basis_backcast = np.stack([t_back ** i for i in range(K)], axis=0)  # (K, Lb)
    basis_forecast = np.stack([t_fore ** i for i in range(K)], axis=0)  # (K, Lf)

    backcast_basis = jnp.asarray(basis_backcast, dtype=jnp.float32)
    forecast_basis = jnp.asarray(basis_forecast, dtype=jnp.float32)

    out_bytes = jnp.dtype(out_dtype).itemsize
    # Per-batch-row block bytes: two f32 theta tiles + both output tiles.
    row_bytes = 4 * 2 * K + out_bytes * (Lb + Lf)
    # v7x is the binding constraint (64 MiB physical / 32 MiB scoped): keep the
    # double-buffered working set under ~24 MiB.
    vmem_budget = 24 * 1024 * 1024
    vmem_cap_rows = max(64, vmem_budget // (2 * row_bytes))
    vmem_limit = 32 * 1024 * 1024  # safe on v5e/v6e/v7x, raises v5e's 16 MiB default

    def forward(theta_b, theta_f):
        batch = theta_b.shape[0]
        assert theta_b.shape == (batch, K)
        assert theta_f.shape == (batch, K)

        if batch <= 512:
            # Single full-extent block (full-extent dims are exempt from the
            # (8,128) divisibility rule).
            tb = batch
        else:
            tb = min(batch_tile, vmem_cap_rows)
            # Force >= 2 grid steps so the "parallel" axis can actually shard
            # across v7x's two TensorCores.
            tb = min(tb, -(-batch // 2))
            # Multiple of 16: bf16-sublane-packing friendly, fine for f32.
            tb = max(16, (tb // 16) * 16)
        grid = (pl.cdiv(batch, tb),)

        cost = pl.CostEstimate(
            flops=2 * batch * K * (Lb + Lf),
            transcendentals=0,
            bytes_accessed=(4 * batch * 2 * K            # theta_b + theta_f
                            + 4 * K * (Lb + Lf)          # bases
                            + out_bytes * batch * (Lb + Lf)),  # outputs
        )

        back, fore = pl.pallas_call(
            _poly_basis_kernel,
            out_shape=(
                jax.ShapeDtypeStruct((batch, Lb), out_dtype),
                jax.ShapeDtypeStruct((batch, Lf), out_dtype),
            ),
            grid=grid,
            in_specs=[
                pl.BlockSpec((tb, K), lambda i: (i, 0)),
                pl.BlockSpec((tb, K), lambda i: (i, 0)),
                # Constant block index -> bases stay resident in VMEM.
                pl.BlockSpec((K, Lb), lambda i: (0, 0)),
                pl.BlockSpec((K, Lf), lambda i: (0, 0)),
            ],
            out_specs=(
                pl.BlockSpec((tb, Lb), lambda i: (i, 0)),
                pl.BlockSpec((tb, Lf), lambda i: (i, 0)),
            ),
            compiler_params=pltpu.CompilerParams(
                dimension_semantics=("parallel",),
                vmem_limit_bytes=vmem_limit,
            ),
            cost_estimate=cost,
        )(theta_b, theta_f, backcast_basis, forecast_basis)

        return fore, back

    return jax.jit(forward), forecast_basis, backcast_basis


if __name__ == "__main__":
    degree = 3
    backcast_length = 16
    forecast_length = 8

    forward_f32, fb_ref, bb_ref = make_polynomial_basis(
        degree, backcast_length, forecast_length)

    key = jax.random.PRNGKey(0)

    # 1) Small-batch path (single full-extent block), exact f32 parity.
    batch = 2
    kb, kf, key = jax.random.split(key, 3)
    theta_b = jax.random.normal(kb, (batch, degree + 1), dtype=jnp.float32)
    theta_f = jax.random.normal(kf, (batch, degree + 1), dtype=jnp.float32)
    forecast, backcast = forward_f32(theta_b, theta_f)
    jax.block_until_ready((forecast, backcast))
    np.testing.assert_allclose(np.asarray(forecast), np.asarray(theta_f @ fb_ref),
                               rtol=1e-5, atol=1e-5)
    np.testing.assert_allclose(np.asarray(backcast), np.asarray(theta_b @ bb_ref),
                               rtol=1e-5, atol=1e-5)

    # 2) Multi-tile path (grid >= 2, exercises batch pipelining + TC sharding).
    big_batch = 4096
    kb, kf, key = jax.random.split(key, 3)
    tb_big = jax.random.normal(kb, (big_batch, degree + 1), dtype=jnp.float32)
    tf_big = jax.random.normal(kf, (big_batch, degree + 1), dtype=jnp.float32)
    fore_big, back_big = forward_f32(tb_big, tf_big)
    jax.block_until_ready((fore_big, back_big))
    np.testing.assert_allclose(np.asarray(fore_big), np.asarray(tf_big @ fb_ref),
                               rtol=1e-5, atol=1e-5)
    np.testing.assert_allclose(np.asarray(back_big), np.asarray(tb_big @ bb_ref),
                               rtol=1e-5, atol=1e-5)

    # 3) Optional bf16-output path (f32 accumulation, cast at store): halves
    #    HBM write traffic; intentionally approximate vs the f32 module.
    forward_bf16, _, _ = make_polynomial_basis(
        degree, backcast_length, forecast_length, out_dtype=jnp.bfloat16)
    fore_b, back_b = forward_bf16(theta_b, theta_f)
    jax.block_until_ready((fore_b, back_b))
    np.testing.assert_allclose(np.asarray(fore_b, dtype=np.float32),
                               np.asarray(theta_f @ fb_ref), rtol=2e-2, atol=2e-2)
    np.testing.assert_allclose(np.asarray(back_b, dtype=np.float32),
                               np.asarray(theta_b @ bb_ref), rtol=2e-2, atol=2e-2)

    print("KERNEL_OK")
</pallas_src>

<mosaic_0001>
module attributes {stable_mosaic.version = 11 : i64} {
  func.func @_poly_basis_kernel(%arg0: i32, %arg1: memref<2x4xf32, #tpu.memory_space<vmem>>, %arg2: memref<2x4xf32, #tpu.memory_space<vmem>>, %arg3: memref<4x16xf32, #tpu.memory_space<vmem>>, %arg4: memref<4x8xf32, #tpu.memory_space<vmem>>, %arg5: memref<2x16xf32, #tpu.memory_space<vmem>>, %arg6: memref<2x8xf32, #tpu.memory_space<vmem>>) attributes {dimension_semantics = [#tpu.dimension_semantics<parallel>], iteration_bounds = array<i64: 1>, scalar_prefetch = 0 : i64, scratch_operands = 0 : i64, tpu.core_type = #tpu.core_type<tc>, window_params = [{transform_indices = @transform_0, window_bounds = array<i64: 2, 4>}, {transform_indices = @transform_1, window_bounds = array<i64: 2, 4>}, {pipeline_mode = #tpu.pipeline_mode<synchronous>, transform_indices = @transform_2, window_bounds = array<i64: 4, 16>}, {pipeline_mode = #tpu.pipeline_mode<synchronous>, transform_indices = @transform_3, window_bounds = array<i64: 4, 8>}, {transform_indices = @transform_4, window_bounds = array<i64: 2, 16>}, {transform_indices = @transform_5, window_bounds = array<i64: 2, 8>}]} {
    %c0 = arith.constant 0 : index
    %c0_0 = arith.constant 0 : index
    %0 = vector.load %arg1[%c0, %c0_0] : memref<2x4xf32, #tpu.memory_space<vmem>>, vector<2x4xf32>
    %c0_1 = arith.constant 0 : index
    %c0_2 = arith.constant 0 : index
    %1 = vector.load %arg3[%c0_1, %c0_2] : memref<4x16xf32, #tpu.memory_space<vmem>>, vector<4x16xf32>
    %cst = arith.constant dense<0.000000e+00> : vector<2x16xf32>
    %2 = tpu.matmul %0, %1, %cst {dimension_numbers = #tpu.dot_dimension_numbers<[1], [0], [0], [1], [0, 0, 1, 1], [], []>} : vector<2x4xf32>, vector<4x16xf32>, vector<2x16xf32> -> vector<2x16xf32>
    %c0_3 = arith.constant 0 : index
    %c0_4 = arith.constant 0 : index
    %3 = vector.load %arg5[%c0_3, %c0_4] : memref<2x16xf32, #tpu.memory_space<vmem>>, vector<2x16xf32>
    tpu.vector_store %arg5[%c0_3, %c0_4], %2 {strides = array<i32>} : memref<2x16xf32, #tpu.memory_space<vmem>>, vector<2x16xf32>,
    %c0_5 = arith.constant 0 : index
    %c0_6 = arith.constant 0 : index
    %4 = vector.load %arg2[%c0_5, %c0_6] : memref<2x4xf32, #tpu.memory_space<vmem>>, vector<2x4xf32>
    %c0_7 = arith.constant 0 : index
    %c0_8 = arith.constant 0 : index
    %5 = vector.load %arg4[%c0_7, %c0_8] : memref<4x8xf32, #tpu.memory_space<vmem>>, vector<4x8xf32>
    %cst_9 = arith.constant dense<0.000000e+00> : vector<2x8xf32>
    %6 = tpu.matmul %4, %5, %cst_9 {dimension_numbers = #tpu.dot_dimension_numbers<[1], [0], [0], [1], [0, 0, 1, 1], [], []>} : vector<2x4xf32>, vector<4x8xf32>, vector<2x8xf32> -> vector<2x8xf32>
    %c0_10 = arith.constant 0 : index
    %c0_11 = arith.constant 0 : index
    %7 = vector.load %arg6[%c0_10, %c0_11] : memref<2x8xf32, #tpu.memory_space<vmem>>, vector<2x8xf32>
    tpu.vector_store %arg6[%c0_10, %c0_11], %6 {strides = array<i32>} : memref<2x8xf32, #tpu.memory_space<vmem>>, vector<2x8xf32>,
    return
  }
  func.func @transform_0(%arg0: i32) -> (i32, i32) {
    %c0_i32 = arith.constant 0 : i32
    %c0_i32_0 = arith.constant 0 : i32
    return %arg0, %c0_i32 : i32, i32
  }
  func.func @transform_1(%arg0: i32) -> (i32, i32) {
    %c0_i32 = arith.constant 0 : i32
    %c0_i32_0 = arith.constant 0 : i32
    return %arg0, %c0_i32 : i32, i32
  }
  func.func @transform_2(%arg0: i32) -> (i32, i32) {
    %c0_i32 = arith.constant 0 : i32
    %c0_i32_0 = arith.constant 0 : i32
    %c0_i32_1 = arith.constant 0 : i32
    return %c0_i32, %c0_i32_0 : i32, i32
  }
  func.func @transform_3(%arg0: i32) -> (i32, i32) {
    %c0_i32 = arith.constant 0 : i32
    %c0_i32_0 = arith.constant 0 : i32
    %c0_i32_1 = arith.constant 0 : i32
    return %c0_i32, %c0_i32_0 : i32, i32
  }
  func.func @transform_4(%arg0: i32) -> (i32, i32) {
    %c0_i32 = arith.constant 0 : i32
    %c0_i32_0 = arith.constant 0 : i32
    return %arg0, %c0_i32 : i32, i32
  }
  func.func @transform_5(%arg0: i32) -> (i32, i32) {
    %c0_i32 = arith.constant 0 : i32
    %c0_i32_0 = arith.constant 0 : i32
    return %arg0, %c0_i32 : i32, i32
  }
}

</mosaic_0001>

<bundles_post_ra>
// kernel: forward.1
= control target key start
LH: loop header
LB: loop body
LE: loop exit
PB: predicated region body
PF: predicated region fallthrough
CT: control target
= control target key end

     0   :  { %11 = vsyncpa [#allocation3], 0  ;;  %s436_s0 = inlined_call_operand.hbm [shape: f32[2,4], index: 0, kind: input, shape index: {}]   ;;  %s437_s1 = inlined_call_operand.hbm [shape: f32[2,4], index: 1, kind: input, shape index: {}]   ;;  %s438_s2 = inlined_call_operand.hbm [shape: f32[4,16], index: 2, kind: input, shape index: {}]   ;;  %s439_s3 = inlined_call_operand.vmem [shape: f32[4,8], index: 3, kind: input, shape index: {}]   ;;  %s440_s4 = inlined_call_operand.hbm [shape: f32[2,16], index: 4, kind: output, shape index: {0}]   ;;  %s441_s5 = inlined_call_operand.hbm [shape: f32[2,8], index: 5, kind: output, shape index: {1}]  }
   0x1   :  { %12 = vsyncpa [#allocation6], 0 }
   0x2   :  { %13 = vsyncpa [#allocation4], 0 }
   0x3   :  { %14 = vsyncpa [#allocation10], 0  ;;  %s381_s18 = smov [#allocation5]   ;;  %s382_s20 = smov [#allocation2]  }
   0x4   :  { %s31_s19 = sshll.u32 %s381_s18, 4  ;;  %s21_s21 = sshll.u32 %s382_s20, 4  ;;  %s32_s19 = int_to_ptr.vmem [resolvable:$true] %s31_s19  ;;  %s22_s21 = int_to_ptr.vmem [resolvable:$true] %s21_s21 }
   0x5   :  { %s281_s22 = scalar_lea.vmem %s32_s19, 32  ;;  %p286_p1 = scmp.lt.s32.totalorder %s32_s19, %s32_s19 }
   0x6   :  { %p282_p0 = scmp.ne.s32.totalorder %s32_s19, %s281_s22  ;;  %p287_p2 = scmp.lt.s32.totalorder %s281_s22, %s281_s22 }
   0x8   :  { %p288_p3 = por %p287_p2, %p286_p1 }
   0xa   :  { %p289_p4 = pnand %p288_p3, %p282_p0 }
   0xc   :  { %292 = shalt.err (!%p289_p4)
}
   0xd   :  { %34 = dma.hbm_to_vmem [thread:$0]  %s437_s1, 32, %s32_s19, [#allocation6]  }
   0xe   :  { %s301_s25 = scalar_lea.vmem %s22_s21, 32  ;;  %p306_p6 = scmp.lt.s32.totalorder %s22_s21, %s22_s21 }
   0xf   :  { %p302_p5 = scmp.ne.s32.totalorder %s22_s21, %s301_s25  ;;  %p307_p7 = scmp.lt.s32.totalorder %s301_s25, %s301_s25 }
  0x11   :  { %p308_p8 = por %p307_p7, %p306_p6 }
  0x13   :  { %p309_p9 = pnand %p308_p8, %p302_p5 }
  0x15   :  { %312 = shalt.err (!%p309_p9)
}
  0x16   :  { %24 = dma.hbm_to_vmem [thread:$0]  %s436_s0, 32, %s22_s21, [#allocation3]  }
  0x17   :  { %s383_s28 = smov [#allocation7]  }
  0x18   :  { %s41_s29 = sshll.u32 %s383_s28, 4  ;;  %s42_s29 = int_to_ptr.vmem [resolvable:$true] %s41_s29 }
  0x19   :  { %s321_s30 = scalar_lea.vmem %s42_s29, 64  ;;  %p326_p11 = scmp.lt.s32.totalorder %s42_s29, %s42_s29 }
  0x1a   :  { %p322_p10 = scmp.ne.s32.totalorder %s42_s29, %s321_s30  ;;  %p327_p12 = scmp.lt.s32.totalorder %s321_s30, %s321_s30 }
  0x1c   :  { %p328_p13 = por %p327_p12, %p326_p11 }
  0x1e   :  { %p329_p0 = pnand %p328_p13, %p322_p10 }
  0x20   :  { %332 = shalt.err (!%p329_p0)
}
  0x21   :  { %44 = dma.hbm_to_vmem [thread:$0]  %s438_s2, 64, %s42_s29, [#allocation6]  }
  0x22   :  { %373 = dma.done.wait [#allocation3], 32  }
  0x23   :  { %374 = vsyncadd [#allocation3], 4294967264 }
  0x24   :  { %375 = dma.done.wait [#allocation6], 96  }
  0x25   :  { %376 = vsyncadd [#allocation6], 4294967200  ;;  %v384_v0 = vmov 0.0   ;;  %vm385_vm0 = vmmov 0   ;;  %vm62_vm1 = vcmask 1043456   ;;  %vm58_vm2 = vcmask 31744  }
  0x26   :  { %256 = vmatprep.subr.mxu0 %v384_v0  ;;  %261 = vmatprep.subr.mxu1 %v384_v0  ;;  %v57_v1 = vld [vmem:[#allocation7] sm:$0xf]  ;;  %v139_v2 = vld [vmem:[%s439_s3] sm:$0xf]  ;;  %s386_s2 = smov [#allocation8]   ;;  %s387_s9 = smov [#allocation9]  }
  0x27   :  { %258 = vmatprep.mubr.msk.f32.mxu0 %vm385_vm0, %v384_v0  ;;  %263 = vmatprep.mubr.msk.f32.mxu1 %vm385_vm0, %v384_v0  ;;  %v56_v3 = vld [vmem:[#allocation2] sm:$0x3]  ;;  %v138_v4 = vld [vmem:[#allocation5] sm:$0x3]  ;;  %s224_s8 = sshll.u32 %s386_s2, 4  ;;  %s234_s10 = sshll.u32 %s387_s9, 4  ;;  %s225_s8 = int_to_ptr.vmem [resolvable:$true] %s224_s8  ;;  %s235_s10 = int_to_ptr.vmem [resolvable:$true] %s234_s10 }
  0x28   :  { %257 = vmatpush3.msk.msra.mxu0 %vm62_vm1, %v57_v1  ;;  %262 = vmatpush3.msk.msra.mxu1 %vm62_vm1, %v139_v2  ;;  %vm136_vm3 = vcmask 123904   ;;  %vm216_vm4 = vcmask 58368   ;;  %s333_s3 = scalar_lea.vmem %s225_s8, 32  ;;  %p338_p2 = scmp.lt.s32.totalorder %s225_s8, %s225_s8 }
  0x29   :  { %259 = vmatmul.mubr.msk.f32.vlgmr.msra.gmra.mxu0 %vm58_vm2, %v56_v3  ;;  %264 = vmatmul.mubr.msk.f32.vlgmr.msra.gmra.mxu1 %vm58_vm2, %v138_v4  ;;  %p334_p1 = scmp.ne.s32.totalorder %s225_s8, %s333_s3  ;;  %p339_p3 = scmp.lt.s32.totalorder %s333_s3, %s333_s3 }
  0x2b   :  { %p340_p4 = por %p339_p3, %p338_p2 }
  0x2d   :  { %p341_p5 = pnand %p340_p4, %p334_p1 }
  0xe9   :  { %v132_v5 = vpop.f32.mrf.mxu0  ;;  %v212_v6 = vpop.f32.mrf.mxu1 }
  0xea   :  { %137 = vst.msk [vmem:[#allocation8] sm:$0x3] %vm136_vm3, %v132_v5 }
  0xeb   :  { %217 = vst.msk [vmem:[#allocation9] sm:$0x3] %vm216_vm4, %v212_v6  ;;  %v260_v7 = vpop.f32.mrf.mxu0  ;;  %v265_v8 = vpop.f32.mrf.mxu1 }
  0xec   :  { %344 = shalt.err (!%p341_p5)
}
  0xed   :  { %227 = dma.vmem_to_hbm [thread:$0]  %s225_s8, 32, %s440_s4, [#allocation4]  }
  0xee   :  { %s353_s13 = scalar_lea.vmem %s235_s10, 32  ;;  %p358_p7 = scmp.lt.s32.totalorder %s235_s10, %s235_s10 }
  0xef   :  { %p354_p6 = scmp.ne.s32.totalorder %s235_s10, %s353_s13  ;;  %p359_p8 = scmp.lt.s32.totalorder %s353_s13, %s353_s13 }
  0xf1   :  { %p360_p9 = por %p359_p8, %p358_p7 }
  0xf3   :  { %p361_p10 = pnand %p360_p9, %p354_p6 }
  0xf5   :  { %364 = shalt.err (!%p361_p10)
}
  0xf6   :  { %237 = dma.vmem_to_hbm [thread:$0]  %s235_s10, 32, %s441_s5, [#allocation10]  }
  0xf7   :  { %377 = dma.done.wait [#allocation4], 32  }
  0xf8   :  { %378 = vsyncadd [#allocation4], 4294967264 }
  0xf9   :  { %379 = dma.done.wait [#allocation10], 32  }
  0xfa   :  { %380 = vsyncadd [#allocation10], 4294967264 }
  0xfb   :  { %244 = vsyncpa [#allocation3], 1 }
  0xfc   :  { %245 = vsyncpa [#allocation6], 1 }
  0xfd   :  { %246 = vsyncpa [#allocation4], 1 }
  0xfe   :  { %247 = vsyncpa [#allocation10], 1 }

</bundles_post_ra>
